<compile_context>
chip_gen: v7x
topology: tpu7x:2x2x1
jax: 0.10.0
libtpu: 0.0.40
codegen_flags: <defaults>
</compile_context>

<pallas_src>
import numpy as np
import jax
import jax.numpy as jnp
from jax.experimental import pallas as pl
from jax.experimental.pallas import tpu as pltpu

BLOCK_SIZE = 64
OUTPUT_STRIDE = 8
COUNTER_DIM = 128
K = BLOCK_SIZE // OUTPUT_STRIDE          # avg-pool kernel inside the counter (= 8)
BN_EPS = 1e-5
LANES = 128                              # TPU lane width
SITE_TILE_TARGET = 256                   # output sites per grid step (feeds v6e/v7x MXU N)


def _cdiv(a, b):
    return -(-a // b)


def _round_up(a, b):
    return _cdiv(a, b) * b


# ----------------------------------------------------------------------------
# Pallas kernel: fused encoder 1x1 conv + Counter('count_regressor') + accm
# ----------------------------------------------------------------------------
def _make_counter_kernel(n_rt, tile_row_stride, band_w, align):
    def kernel(x_ref, band_ref, wenc_ref, w1_ref, bnb_ref, w2_ref, nrm_ref, out_ref):
        # x_ref:    (1, CIN_PAD, HP*W) bf16  stride-8 pooled image, batch element b
        # band_ref: (band_w, TR_PAD)   bf16  0/1 kxk window-membership band (one row tile)
        # wenc_ref: (C, CIN_PAD)       bf16  encoder 1x1 conv weights [out, in]
        # w1_ref:   (C, C)             f32   conv1 [out, in] * (1/k^2) * bn_scale
        # bnb_ref:  (C, 1)             f32   beta - running_mean * bn_scale
        # w2_ref:   (1, C)             f32   conv2 weights
        # nrm_ref:  (1, 2, TR_PAD)     f32   [0] = accm scale, [1] = b2 * accm
        # out_ref:  (1, 1, 1, TR_PAD)  f32
        if n_rt == 1:
            x_band = x_ref[0]                                   # static: whole map is the band
        else:
            r0 = pl.multiple_of(pl.program_id(1) * tile_row_stride, align)
            x_band = x_ref[0, :, pl.ds(r0, band_w)]             # (CIN_PAD, band_w) halo band

        # Fused encoder 1x1 conv + ReLU (feature map never touches HBM).
        feat = jnp.dot(wenc_ref[...], x_band,
                       preferred_element_type=jnp.float32)      # (C, band_w)
        feat = jnp.maximum(feat, 0.0).astype(jnp.bfloat16)

        # AvgPool2d((k,k), stride=1) over the halo band as one banded MXU matmul
        # (the 1/k^2 factor is folded into w1).  bf16 x bf16 -> f32 accumulation.
        pooled = jnp.dot(feat, band_ref[...],
                         preferred_element_type=jnp.float32)    # (C, TR_PAD)

        # Conv2d(C,C,1,bias=False) + BatchNorm(eval) + ReLU for all sites at once.
        h = jnp.dot(w1_ref[...], pooled, preferred_element_type=jnp.float32)
        h = jnp.maximum(h + bnb_ref[...], 0.0)                  # (C, TR_PAD)

        # Conv2d(C,1,1) as an MXU contraction (keeps VALU/XLU slots free).
        row = jnp.dot(w2_ref[...], h,
                      preferred_element_type=jnp.float32)       # (1, TR_PAD)

        # gpu_normalizer: (row + b2) * accm  ==  row*accm + (b2*accm); lane-dense store.
        nrm = nrm_ref[0]
        out_ref[0, 0] = (row * nrm[0:1, :] + nrm[1:2, :]).astype(out_ref.dtype)

    return kernel


# ----------------------------------------------------------------------------
# Host-side constants (vectorized numpy — no O(HW * n_sites) Python loops)
# ----------------------------------------------------------------------------
def _make_band_matrix(tr, wo, W, k, tr_pad, band_rows):
    """band[r*W + c, ro*wo + co] = 1 iff feature element (r, c) of the halo band
    lies inside the kxk window of output site (ro, co).  Identical for every
    row tile."""
    r = np.arange(band_rows)[:, None]
    ro = np.arange(tr)[None, :]
    row_hit = ((r >= ro) & (r < ro + k)).astype(np.float32)           # (band_rows, tr)
    c = np.arange(W)[:, None]
    co = np.arange(wo)[None, :]
    col_hit = ((c >= co) & (c < co + k)).astype(np.float32)           # (W, wo)
    band = np.einsum('ra,cb->rcab', row_hit, col_hit)
    band = band.reshape(band_rows * W, tr * wo)
    out = np.zeros((band_rows * W, tr_pad), np.float32)
    out[:, :tr * wo] = band
    return out


def _gpu_normalizer_accm(imh, imw, bk, os_):
    """Normalizer.gpu_normalizer accm map, computed separably per axis.
    Matches F.fold(ones) -> 1/. -> /bk^2 -> F.unfold(.).sum(1)."""
    def axis_window_sums(size, n_out):
        pos = np.arange(size)[:, None]
        start = np.arange(n_out)[None, :] * os_
        hit = (pos >= start) & (pos < start + bk)          # window membership (size, n_out)
        cnt = hit.sum(axis=1).astype(np.float64)           # fold(ones) per pixel
        inv = np.where(cnt > 0, 1.0 / np.maximum(cnt, 1.0), 0.0)
        return hit.T.astype(np.float64) @ inv              # window sums of 1/count
    h = (imh - bk) // os_ + 1
    w = (imw - bk) // os_ + 1
    return (np.outer(axis_window_sums(imh, h), axis_window_sums(imw, w))
            / float(bk * bk)).astype(np.float32)           # (h, w)


# ----------------------------------------------------------------------------
# Full CountingModels.forward
# ----------------------------------------------------------------------------
def counting_models_forward(img, params, is_normalize=True):
    B, cin, imh, imw = img.shape
    os_, bk, k, C = OUTPUT_STRIDE, BLOCK_SIZE, K, COUNTER_DIM
    H, W = imh // os_, imw // os_
    ho, wo = H - k + 1, W - k + 1

    # Stand-in encoder, front half: stride-8 average pool (stays in XLA).
    # TODO(synk): the real 'tasselnetv2plus' backbone lives in the external
    # `tasselnet` module; only its final 1x1 conv + ReLU is modeled here and is
    # fused into the Pallas kernel below.  Decoder('no_decoder') is identity.
    x = img.reshape(B, cin, H, os_, W, os_).mean(axis=(3, 5))          # (B, cin, H, W)

    # ---- row-tile / halo geometry -------------------------------------------
    tr = min(ho, max(1, SITE_TILE_TARGET // max(wo, 1)))   # output rows per grid step
    if tr < ho:
        tr = max(8, (tr // 8) * 8)                         # 8-aligned dynamic VMEM slices
    n_rt = _cdiv(ho, tr)
    sites_per_tile = tr * wo
    tr_pad = _round_up(sites_per_tile, LANES)              # lane-dense output tile
    band_rows = tr + k - 1                                  # (k-1)-row halo
    band_w = band_rows * W
    hp = n_rt * tr + k - 1                                  # padded feature rows
    cin_pad = _round_up(max(cin, 1), 8)
    align = (tr * W) & -(tr * W)                            # pow2 alignment of row-tile stride

    # ---- operands: big ones bf16, resident weights f32 -----------------------
    xp = jnp.zeros((B, cin_pad, hp, W), jnp.float32).at[:, :cin, :H, :].set(x)
    xp = xp.reshape(B, cin_pad, hp * W).astype(jnp.bfloat16)

    wenc_pad = jnp.zeros((C, cin_pad), jnp.float32).at[:, :cin].set(params['w_enc'].T)
    wenc_pad = wenc_pad.astype(jnp.bfloat16)

    bn_scale = params['bn_gamma'] / jnp.sqrt(params['bn_var'] + BN_EPS)        # (C,)
    w1_fold = params['w1'] * (bn_scale / float(k * k))[:, None]                # (C, C) f32
    bnb_col = (params['bn_beta'] - params['bn_mean'] * bn_scale)[:, None]      # (C, 1) f32
    w2_row = params['w2'].reshape(1, C).astype(jnp.float32)

    band = jnp.asarray(_make_band_matrix(tr, wo, W, k, tr_pad, band_rows),
                       dtype=jnp.bfloat16)                                     # (band_w, tr_pad)

    if is_normalize:
        accm = _gpu_normalizer_accm(imh, imw, bk, os_)                         # (ho, wo)
    else:
        accm = np.ones((ho, wo), np.float32)
    accm_pad = np.zeros((n_rt * tr, wo), np.float32)
    accm_pad[:ho] = accm
    scale_np = np.zeros((n_rt, tr_pad), np.float32)
    scale_np[:, :sites_per_tile] = accm_pad.reshape(n_rt, sites_per_tile)
    scale_rows = jnp.asarray(scale_np)
    nrm = jnp.stack([scale_rows, scale_rows * params['b2'][0]], axis=1)        # (n_rt, 2, tr_pad)

    # ---- explicit VMEM budget (v7x has only 64 MiB physical / 32 MiB default) --
    vmem_need = (
        2 * cin_pad * hp * W * 2                   # pooled-image block (bf16, double-buffered)
        + 2 * band_w * tr_pad * 2                  # band matrix (bf16)
        + 2 * (C * cin_pad * 2 + C * C * 4 + C * 4 + C * 4)   # weights
        + 2 * (2 * tr_pad * 4 + tr_pad * 4)        # nrm + out blocks
        + (C * band_w + 2 * C * tr_pad) * 4        # in-kernel f32 intermediates
    )
    vmem_limit = int(min(max(2 * vmem_need, 16 * 1024 * 1024), 32 * 1024 * 1024))

    kernel = _make_counter_kernel(n_rt, tr * W, band_w, align)
    out = pl.pallas_call(
        kernel,
        out_shape=jax.ShapeDtypeStruct((B, n_rt, 1, tr_pad), jnp.float32),
        grid=(B, n_rt),
        in_specs=[
            # Block index changes only with b -> re-DMA'd once per batch element.
            # TODO(synk): pipeline_mode=pl.Buffered(1) here at production sizes.
            pl.BlockSpec((1, cin_pad, hp * W), lambda b, rt: (b, 0, 0)),
            pl.BlockSpec((band_w, tr_pad), lambda b, rt: (0, 0)),
            pl.BlockSpec((C, cin_pad), lambda b, rt: (0, 0)),
            pl.BlockSpec((C, C), lambda b, rt: (0, 0)),
            pl.BlockSpec((C, 1), lambda b, rt: (0, 0)),
            pl.BlockSpec((1, C), lambda b, rt: (0, 0)),
            pl.BlockSpec((1, 2, tr_pad), lambda b, rt: (rt, 0, 0)),
        ],
        out_specs=pl.BlockSpec((1, 1, 1, tr_pad), lambda b, rt: (b, rt, 0, 0)),
        compiler_params=pltpu.CompilerParams(
            dimension_semantics=("parallel", "parallel"),
            vmem_limit_bytes=vmem_limit),
    )(xp, band, wenc_pad, w1_fold, bnb_col, w2_row, nrm)

    out = out[:, :, 0, :sites_per_tile].reshape(B, n_rt * tr, wo)[:, :ho, :]
    if is_normalize:
        return jnp.squeeze(out)          # gpu_normalizer returns x.squeeze()
    return out[:, None, :, :]            # raw counter output (B, 1, ho, wo)


# ----------------------------------------------------------------------------
# Literal, unfused f32 reference (validates the 1/k^2 + BatchNorm fold & bf16)
# ----------------------------------------------------------------------------
def _reference_forward(img, params, is_normalize=True):
    B, cin, imh, imw = img.shape
    os_, k, C = OUTPUT_STRIDE, K, COUNTER_DIM
    H, W = imh // os_, imw // os_
    ho, wo = H - k + 1, W - k + 1
    x = img.reshape(B, cin, H, os_, W, os_).mean(axis=(3, 5))
    feat = jax.nn.relu(jnp.einsum('bchw,cd->bdhw', x, params['w_enc']))
    pooled = jnp.zeros((B, C, ho, wo), jnp.float32)
    for di in range(k):
        for dj in range(k):
            pooled = pooled + feat[:, :, di:di + ho, dj:dj + wo]
    pooled = pooled / float(k * k)
    h = jnp.einsum('oc,bchw->bohw', params['w1'], pooled)
    scale = params['bn_gamma'] / jnp.sqrt(params['bn_var'] + BN_EPS)
    h = jax.nn.relu(h * scale[None, :, None, None]
                    + (params['bn_beta'] - params['bn_mean'] * scale)[None, :, None, None])
    out = jnp.einsum('oc,bchw->bohw', params['w2'], h) + params['b2'][0]
    if is_normalize:
        accm = jnp.asarray(_gpu_normalizer_accm(imh, imw, BLOCK_SIZE, os_))
        return jnp.squeeze(out * accm[None, None])
    return out


if __name__ == "__main__":
    key = jax.random.PRNGKey(0)
    ks = jax.random.split(key, 8)

    B, Cin, imh, imw = 2, 3, 128, 128
    C = COUNTER_DIM
    img = jax.random.normal(ks[0], (B, Cin, imh, imw), dtype=jnp.float32)

    # Params in PyTorch-native layout (Conv2d weights [out, in]; BN running stats
    # explicit and non-trivial) so the host-side fold is validated below.
    params = {
        'w_enc':    jax.random.normal(ks[1], (Cin, C), jnp.float32) * 0.01,
        'w1':       jax.random.normal(ks[2], (C, C), jnp.float32) * 0.01,   # conv1 [out, in]
        'bn_gamma': 1.0 + 0.1 * jax.random.normal(ks[3], (C,), jnp.float32),
        'bn_beta':  1e-4 * jax.random.normal(ks[4], (C,), jnp.float32),
        'bn_mean':  1e-4 * jax.random.normal(ks[5], (C,), jnp.float32),
        'bn_var':   0.5 + jax.random.uniform(ks[6], (C,), jnp.float32),
        'w2':       jax.random.normal(ks[7], (1, C), jnp.float32) * 0.01,   # conv2 [out, in]
        'b2':       1e-6 * jnp.ones((1,), jnp.float32),
    }

    out = counting_models_forward(img, params, is_normalize=True)
    out = jax.block_until_ready(out)

    ho = (imh // OUTPUT_STRIDE) - K + 1
    wo = (imw // OUTPUT_STRIDE) - K + 1
    assert out.shape == (B, ho, wo), out.shape

    ref = jax.block_until_ready(_reference_forward(img, params, is_normalize=True))
    err = float(jnp.max(jnp.abs(out - ref)))
    scl = float(jnp.max(jnp.abs(ref)))
    assert err <= 5e-2 * scl + 1e-9, (err, scl)

    print("KERNEL_OK")
</pallas_src>

<mosaic_0001>
module attributes {stable_mosaic.version = 11 : i64} {
  func.func @kernel(%arg0: i32, %arg1: i32, %arg2: memref<1x8x256xbf16, #tpu.memory_space<vmem>>, %arg3: memref<256x128xbf16, #tpu.memory_space<vmem>>, %arg4: memref<128x8xbf16, #tpu.memory_space<vmem>>, %arg5: memref<128x128xf32, #tpu.memory_space<vmem>>, %arg6: memref<128x1xf32, #tpu.memory_space<vmem>>, %arg7: memref<1x128xf32, #tpu.memory_space<vmem>>, %arg8: memref<1x2x128xf32, #tpu.memory_space<vmem>>, %arg9: memref<1x1x1x128xf32, #tpu.memory_space<vmem>>) attributes {dimension_semantics = [#tpu.dimension_semantics<parallel>, #tpu.dimension_semantics<parallel>], iteration_bounds = array<i64: 2, 1>, scalar_prefetch = 0 : i64, scratch_operands = 0 : i64, tpu.core_type = #tpu.core_type<tc>, window_params = [{transform_indices = @transform_0, window_bounds = array<i64: 1, 8, 256>}, {pipeline_mode = #tpu.pipeline_mode<synchronous>, transform_indices = @transform_1, window_bounds = array<i64: 256, 128>}, {pipeline_mode = #tpu.pipeline_mode<synchronous>, transform_indices = @transform_2, window_bounds = array<i64: 128, 8>}, {pipeline_mode = #tpu.pipeline_mode<synchronous>, transform_indices = @transform_3, window_bounds = array<i64: 128, 128>}, {pipeline_mode = #tpu.pipeline_mode<synchronous>, transform_indices = @transform_4, window_bounds = array<i64: 128, 1>}, {pipeline_mode = #tpu.pipeline_mode<synchronous>, transform_indices = @transform_5, window_bounds = array<i64: 1, 128>}, {transform_indices = @transform_6, window_bounds = array<i64: 1, 2, 128>}, {transform_indices = @transform_7, window_bounds = array<i64: 1, 1, 1, 128>}]} {
    %c0 = arith.constant 0 : index
    %c0_0 = arith.constant 0 : index
    %c0_1 = arith.constant 0 : index
    %0 = vector.load %arg2[%c0, %c0_0, %c0_1] : memref<1x8x256xbf16, #tpu.memory_space<vmem>>, vector<1x8x256xbf16>
    %1 = vector.shape_cast %0 : vector<1x8x256xbf16> to vector<8x256xbf16>
    %c0_2 = arith.constant 0 : index
    %c0_3 = arith.constant 0 : index
    %2 = vector.load %arg4[%c0_2, %c0_3] : memref<128x8xbf16, #tpu.memory_space<vmem>>, vector<128x8xbf16>
    %cst = arith.constant dense<0.000000e+00> : vector<128x256xf32>
    %3 = tpu.matmul %2, %1, %cst {dimension_numbers = #tpu.dot_dimension_numbers<[1], [0], [0], [1], [0, 0, 1, 1], [], []>} : vector<128x8xbf16>, vector<8x256xbf16>, vector<128x256xf32> -> vector<128x256xf32>
    %cst_4 = arith.constant 0.000000e+00 : f32
    %4 = vector.broadcast %cst_4 : f32 to vector<128x256xf32>
    %5 = arith.maximumf %3, %4 : vector<128x256xf32>
    %6 = arith.truncf %5 : vector<128x256xf32> to vector<128x256xbf16>
    %c0_5 = arith.constant 0 : index
    %c0_6 = arith.constant 0 : index
    %7 = vector.load %arg3[%c0_5, %c0_6] : memref<256x128xbf16, #tpu.memory_space<vmem>>, vector<256x128xbf16>
    %cst_7 = arith.constant dense<0.000000e+00> : vector<128x128xf32>
    %8 = tpu.matmul %6, %7, %cst_7 {dimension_numbers = #tpu.dot_dimension_numbers<[1], [0], [0], [1], [0, 0, 1, 1], [], []>} : vector<128x256xbf16>, vector<256x128xbf16>, vector<128x128xf32> -> vector<128x128xf32>
    %c0_8 = arith.constant 0 : index
    %c0_9 = arith.constant 0 : index
    %9 = vector.load %arg5[%c0_8, %c0_9] : memref<128x128xf32, #tpu.memory_space<vmem>>, vector<128x128xf32>
    %cst_10 = arith.constant dense<0.000000e+00> : vector<128x128xf32>
    %10 = tpu.matmul %9, %8, %cst_10 {dimension_numbers = #tpu.dot_dimension_numbers<[1], [0], [0], [1], [0, 0, 1, 1], [], []>} : vector<128x128xf32>, vector<128x128xf32>, vector<128x128xf32> -> vector<128x128xf32>
    %c0_11 = arith.constant 0 : index
    %c0_12 = arith.constant 0 : index
    %11 = vector.load %arg6[%c0_11, %c0_12] : memref<128x1xf32, #tpu.memory_space<vmem>>, vector<128x1xf32>
    %12 = vector.broadcast %11 : vector<128x1xf32> to vector<128x128xf32>
    %13 = arith.addf %10, %12 : vector<128x128xf32>
    %cst_13 = arith.constant 0.000000e+00 : f32
    %14 = vector.broadcast %cst_13 : f32 to vector<128x128xf32>
    %15 = arith.maximumf %13, %14 : vector<128x128xf32>
    %c0_14 = arith.constant 0 : index
    %c0_15 = arith.constant 0 : index
    %16 = vector.load %arg7[%c0_14, %c0_15] : memref<1x128xf32, #tpu.memory_space<vmem>>, vector<1x128xf32>
    %cst_16 = arith.constant dense<0.000000e+00> : vector<1x128xf32>
    %17 = tpu.matmul %16, %15, %cst_16 {dimension_numbers = #tpu.dot_dimension_numbers<[1], [0], [0], [1], [0, 0, 1, 1], [], []>} : vector<1x128xf32>, vector<128x128xf32>, vector<1x128xf32> -> vector<1x128xf32>
    %c0_17 = arith.constant 0 : index
    %c0_18 = arith.constant 0 : index
    %c0_19 = arith.constant 0 : index
    %18 = vector.load %arg8[%c0_17, %c0_18, %c0_19] : memref<1x2x128xf32, #tpu.memory_space<vmem>>, vector<1x2x128xf32>
    %19 = vector.shape_cast %18 : vector<1x2x128xf32> to vector<2x128xf32>
    %20 = vector.extract_strided_slice %19 {offsets = [0, 0], sizes = [1, 128], strides = [1, 1]} : vector<2x128xf32> to vector<1x128xf32>
    %21 = arith.mulf %17, %20 : vector<1x128xf32>
    %22 = vector.extract_strided_slice %19 {offsets = [1, 0], sizes = [1, 128], strides = [1, 1]} : vector<2x128xf32> to vector<1x128xf32>
    %23 = arith.addf %21, %22 : vector<1x128xf32>
    %c0_20 = arith.constant 0 : index
    %c0_21 = arith.constant 0 : index
    %c0_22 = arith.constant 0 : index
    %c0_23 = arith.constant 0 : index
    %24 = vector.load %arg9[%c0_20, %c0_21, %c0_22, %c0_23] : memref<1x1x1x128xf32, #tpu.memory_space<vmem>>, vector<1x1x1x128xf32>
    %25 = vector.shape_cast %24 : vector<1x1x1x128xf32> to vector<1x128xf32>
    %26 = vector.shape_cast %23 : vector<1x128xf32> to vector<1x1x1x128xf32>
    tpu.vector_store %arg9[%c0_20, %c0_21, %c0_22, %c0_23], %26 {strides = array<i32>} : memref<1x1x1x128xf32, #tpu.memory_space<vmem>>, vector<1x1x1x128xf32>,
    return
  }
  func.func @transform_0(%arg0: i32, %arg1: i32) -> (i32, i32, i32) {
    %c0_i32 = arith.constant 0 : i32
    %c0_i32_0 = arith.constant 0 : i32
    %c0_i32_1 = arith.constant 0 : i32
    return %arg0, %c0_i32, %c0_i32_0 : i32, i32, i32
  }
  func.func @transform_1(%arg0: i32, %arg1: i32) -> (i32, i32) {
    %c0_i32 = arith.constant 0 : i32
    %c0_i32_0 = arith.constant 0 : i32
    %c0_i32_1 = arith.constant 0 : i32
    return %c0_i32, %c0_i32_0 : i32, i32
  }
  func.func @transform_2(%arg0: i32, %arg1: i32) -> (i32, i32) {
    %c0_i32 = arith.constant 0 : i32
    %c0_i32_0 = arith.constant 0 : i32
    %c0_i32_1 = arith.constant 0 : i32
    return %c0_i32, %c0_i32_0 : i32, i32
  }
  func.func @transform_3(%arg0: i32, %arg1: i32) -> (i32, i32) {
    %c0_i32 = arith.constant 0 : i32
    %c0_i32_0 = arith.constant 0 : i32
    %c0_i32_1 = arith.constant 0 : i32
    return %c0_i32, %c0_i32_0 : i32, i32
  }
  func.func @transform_4(%arg0: i32, %arg1: i32) -> (i32, i32) {
    %c0_i32 = arith.constant 0 : i32
    %c0_i32_0 = arith.constant 0 : i32
    %c0_i32_1 = arith.constant 0 : i32
    return %c0_i32, %c0_i32_0 : i32, i32
  }
  func.func @transform_5(%arg0: i32, %arg1: i32) -> (i32, i32) {
    %c0_i32 = arith.constant 0 : i32
    %c0_i32_0 = arith.constant 0 : i32
    %c0_i32_1 = arith.constant 0 : i32
    return %c0_i32, %c0_i32_0 : i32, i32
  }
  func.func @transform_6(%arg0: i32, %arg1: i32) -> (i32, i32, i32) {
    %c0_i32 = arith.constant 0 : i32
    %c0_i32_0 = arith.constant 0 : i32
    %c0_i32_1 = arith.constant 0 : i32
    return %arg1, %c0_i32, %c0_i32_0 : i32, i32, i32
  }
  func.func @transform_7(%arg0: i32, %arg1: i32) -> (i32, i32, i32, i32) {
    %c0_i32 = arith.constant 0 : i32
    %c0_i32_0 = arith.constant 0 : i32
    %c0_i32_1 = arith.constant 0 : i32
    return %arg0, %arg1, %c0_i32, %c0_i32_0 : i32, i32, i32, i32
  }
}

</mosaic_0001>

<bundles_post_ra>
// kernel: tpu_custom_call.1
= control target key start
LH: loop header
LB: loop body
LE: loop exit
PB: predicated region body
PF: predicated region fallthrough
CT: control target
= control target key end

     0   :  { %12 = vsyncpa [#allocation3], 0  ;;  %s2120_s0 = inlined_call_operand.vmem [shape: bf16[2,8,256], index: 0, kind: input, shape index: {}]   ;;  %s2121_s1 = inlined_call_operand.vmem [shape: bf16[256,128], index: 1, kind: input, shape index: {}]   ;;  %s2122_s2 = inlined_call_operand.vmem [shape: bf16[128,8], index: 2, kind: input, shape index: {}]   ;;  %s2123_s3 = inlined_call_operand.hbm [shape: f32[128,128], index: 3, kind: input, shape index: {}]   ;;  %s2124_s4 = inlined_call_operand.vmem [shape: f32[128,1], index: 4, kind: input, shape index: {}]   ;;  %s2125_s5 = inlined_call_operand.vmem [shape: f32[1,128], index: 5, kind: input, shape index: {}]   ;;  %s2126_s6 = inlined_call_operand.vmem [shape: f32[1,2,128], index: 6, kind: input, shape index: {}]   ;;  %s2127_s7 = inlined_call_operand.hbm [shape: f32[2,1,1,128], index: 7, kind: output, shape index: {}]  }
   0x1   :  { %13 = vsyncpa [#allocation4], 0 }
   0x2   :  { %15 = vsyncpa [#allocation4 + $0x1], 0  ;;  %s1828_s24 = smov 0   ;;  %s1830_s25 = smov 0  }
   0x3   :  { %s1832_s26 = smov 0   ;;  %s1834_s27 = smov 0  }
   0x4   :  { %s1836_s28 = smov 0   ;;  %s1838_s29 = smov 0  }
   0x5 LB: > { %s1259_s30 = sadd.s32 4294967295, %s1778_s29   ;;  %s1260_s8 = sadd.s32 4294967294, %s1778_s29   ;;  %s1778_s29 = sphi %s1838_s29, %s21_s29   ;;  %s1774_s28 = sphi %s1836_s28, %s2145_s28   ;;  %s1770_s27 = sphi %s1834_s27, %s2144_s27   ;;  %s1766_s26 = sphi %s1832_s26, %s2143_s26   ;;  %s1762_s25 = sphi %s1830_s25, %s2142_s25   ;;  %s1758_s24 = sphi %s1828_s24, %s2141_s24  }
   0x6   : > { %s33_s9 = sadd.s32 1, %s1774_s28  ;;  %s199_s10 = sadd.s32 1, %s1766_s26 }
   0x7   : > { %p35_p0 = scmp.ge.s32.totalorder %s33_s9, 2  ;;  %p209_p1 = scmp.ne.s32.totalorder %s1766_s26, %s1762_s25 }
   0x8   : > { %p210_p2 = scmp.eq.s32.totalorder %s1259_s30, 1  ;;  %p215_p3 = scmp.ne.s32.totalorder %s1762_s25, %s1758_s24 }
   0x9   : > { %s2147_s9 = smov (%p35_p0, %s33_s9), 0  ;;  %p216_p5 = scmp.eq.s32.totalorder %s1260_s8, 1 }
   0xa   : > { %p1868_p4 = por %p210_p2, %p209_p1  ;;  %s194_s12 = ssub.s32 %s1774_s28, %s2147_s9 }
   0xb   : > { %p1261_p6 = scmp.ge.s32.totalorder %s1778_s29, 1  ;;  %p197_p7 = scmp.eq.s32.totalorder %s194_s12, 0 }
   0xc   : > { %s2132_s11 = scalar_select %p1868_p4, 1, 0 }
   0xd   : > { %p1875_p8 = por %p216_p5, %p215_p3  ;;  %p223_p9 = scmp.lt.s32.totalorder %s1778_s29, 3 }
   0xe   : > { %s1881_s14 = scalar_select %p197_p7, %s1766_s26, %s199_s10  }
   0xf   : > { %s2133_s13 = scalar_select %p1875_p8, 1, 0 }
  0x10   : > { %p1883_p10 = pnand %p1261_p6, %p223_p9  ;;  %p1887_p11 = scmp.eq.s32.totalorder %s1259_s30, 0 }
  0x11   : > { %s1780_s17 = smov [#allocation2]   ;;  %s1668_s22 = scalar_lea.hbm %s2123_s3, 2048 }
  0x12   : > { %s2134_s15 = scalar_select %p1883_p10, 1, 0 }
  0x13   : > { %s2135_s16 = scalar_select %p1887_p11, 1, 0 }
  0x14   : > { %p1574_p12 = pneg %p1883_p10  ;;  %s241_s18 = sshll.u32 %s1780_s17, 4  ;;  %s242_s18 = int_to_ptr.vmem [resolvable:$true] %s241_s18 }
  0x15   : > { %p1669_p0 = scmp.ne.s32.totalorder %s2123_s3, %s1668_s22  ;;  %p1675_p5 = scmp.lt.u32.totalorder %s1668_s22, %s2123_s3 }
  0x16   : > { %p1895_p13 = pnand %p1887_p11, %p1574_p12 }
  0x18   : > { %p1670_p1 = pneg %p1895_p13 }
  0x1a   : > { %p1671_p2 = pnand %p1670_p1, %p1669_p0 }
  0x1c   : > { %p1672_p3 = pneg %p1671_p2 }
  0x1e   : > { %p1677_p6 = pnand %p1675_p5, %p1672_p3 }
  0x20   : > { %1680 = shalt.err (!%p1677_p6)
}
  0x21   : > { %s1681_s12 = scalar_lea.vmem %s242_s18, 2048  ;;  %p1689_p8 = scmp.lt.s32.totalorder %s242_s18, %s242_s18 }
  0x22   : > { %p1682_p7 = scmp.ne.s32.totalorder %s242_s18, %s1681_s12  ;;  %p1690_p4 = scmp.lt.s32.totalorder %s1681_s12, %s1681_s12 }
  0x24   : > { %p1684_p9 = pnand %p1682_p7, %p1670_p1  ;;  %p1691_p11 = por %p1690_p4, %p1689_p8 }
  0x26   : > { %p1685_p12 = pneg %p1684_p9 }
  0x28   : > { %p1692_p10 = pnand %p1691_p11, %p1685_p12 }
  0x2a   : > { %1695 = shalt.err (!%p1692_p10)
}
  0x2b   : > { %s1781_s17 = smov 128   ;;  %s1782_s20 = smov 8  }
  0x2c   : > { %1577 = dma.hbm_to_vmem [thread:$0]  (!%p1895_p13), %s2123_s3, 2048, %s242_s18, [#allocation3], %s1781_s17, %s1781_s17, %s1782_s20  }
  0x2d   : > { %p2137_p0 = scmp.ne.s32.totalorder %s2134_s15, 0 }
  0x2e   : > { %p2138_p2 = scmp.ne.s32.totalorder (!%p2137_p0), %s2135_s16, 0 }
  0x2f   : > { %278 = sbr.rel (%p2137_p0) target bundleno = 1047 (0x417), region = 48 }
  0x36   : > { %1749 = dma.done.wait (%p2138_p2), [#allocation3], 2048  }
  0x37   : > { %1751 = vsyncadd (%p2138_p2), [#allocation3], 4294965248  ;;  %p313_p4 = scmp.lt.s32.totalorder %s1770_s27, 1  ;;  %v1783_v0 = vmov 0   ;;  %vm410_vm0 = vcmask 1043456   ;;  %v1644_v5 = vld [vmem:[%s2122_s2] sm:$0xff]  }
  0x38   : > { %449 = vmatprep.mubr.bf16.mxu0 %v1783_v0  ;;  %1640 = vset.pattern.permute.xlu0 %v1783_v0  ;;  %vm385_vm1 = vcmask 64512   ;;  %v1645_v6 = vld [vmem:[%s2122_s2 + $0x8] sm:$0xff]   ;;  %v1652_v7 = vld [vmem:[%s2121_s1 + $0x40] sm:$0xff]   ;;  %v1656_v11 = vld [vmem:[%s2121_s1 + $0x50] sm:$0xff]   ;;  %vm1785_vm2 = vmmov 0   ;;  %s311_s17 = sand.u32 1, %s1762_s25  }
  0x39   : > { %s314_s19 = scalar_select %p313_p4, %s1770_s27, 1  ;;  %1641 = vset.pattern.permute.xlu1 %v1783_v0  ;;  %v1653_v8 = vld [vmem:[%s2121_s1] sm:$0xff]   ;;  %1308 = vmatprep.subr.bf16.mxu1 %v1652_v7  ;;  %v1654_v9 = vld [vmem:[%s2121_s1 + $0x48] sm:$0xff]   ;;  %v1657_v12 = vld [vmem:[%s2121_s1 + $0x10] sm:$0xff]  }
  0x3a   : > { %1309 = vmatpush3.bf16.msra.mxu1 %v1653_v8  ;;  %v1655_v10 = vld [vmem:[%s2121_s1 + $0x8] sm:$0xff]   ;;  %v1658_v13 = vld [vmem:[%s2121_s1 + $0x58] sm:$0xff]   ;;  %v1646_v14 = vld [vmem:[%s2122_s2 + $0x10] sm:$0xff]   ;;  %s1304_s23 = sshll.u32 %s1770_s27, 4  ;;  %s1155_s16 = scalar_lea.sflag [#allocation4], %s311_s17 }
  0x3b   : > { %s1307_s22 = sshll.u32 %s314_s19, 3  ;;  %1310 = vmatprep.subr.bf16.mxu1 %v1654_v9  ;;  %v1659_v15 = vld [vmem:[%s2121_s1 + $0x18] sm:$0xff]   ;;  %v1660_v16 = vld [vmem:[%s2121_s1 + $0x60] sm:$0xff]   ;;  %v1662_v18 = vld [vmem:[%s2121_s1 + $0x68] sm:$0xff]   ;;  %s312_s19 = scalar_lea.vmem [#allocation5], %s311_s17 }
  0x3c   : > { %s317_s15 = scalar_lea.vmem %s2120_s0, %s1307_s22  ;;  %v1661_v17 = vld [vmem:[%s2121_s1 + $0x20] sm:$0xff]   ;;  %v1647_v19 = vld [vmem:[%s2122_s2 + $0x18] sm:$0xff]   ;;  %v1663_v20 = vld [vmem:[%s2121_s1 + $0x28] sm:$0xff]   ;;  %s1168_s22 = sshll.u32 %s312_s19, 4  ;;  %s2075_s22 = int_to_ptr.vmem [resolvable:$true] %s1168_s22 }
  0x3d   : > { %v323_v1 = vld [vmem:[%s317_s15] sm:$0xff]  ;;  %v1649_v22 = vld [vmem:[%s2122_s2 + $0x28] sm:$0xff]   ;;  %v1650_v23 = vld [vmem:[%s2122_s2 + $0x30] sm:$0xff]   ;;  %s2073_s15 = scalar_lea.hbm %s2127_s7, %s1304_s23  ;;  %s1696_s8 = scalar_lea.vmem %s2075_s22, 16 }
  0x3e   : > { %v1278_v2 = vcombine.high %v323_v1, %v323_v1  ;;  %v1277_v3 = vcombine.low %v323_v1, %v323_v1  ;;  %1311 = vmatpush3.bf16.msra.mxu1 %v1655_v10  ;;  %v1648_v21 = vld [vmem:[%s2122_s2 + $0x20] sm:$0xff]   ;;  %v1651_v24 = vld [vmem:[%s2122_s2 + $0x38] sm:$0xff]   ;;  %v1664_v25 = vld [vmem:[%s2121_s1 + $0x70] sm:$0xff]   ;;  %p1697_p8 = scmp.ne.s32.totalorder %s2075_s22, %s1696_s8  ;;  %p2139_p10 = scmp.ne.s32.totalorder %s2132_s11, 0 }
  0x3f   : > { %1312 = vmatprep.subr.bf16.mxu1 %v1656_v11  ;;  %v1665_v26 = vld [vmem:[%s2121_s1 + $0x30] sm:$0xff]   ;;  %v1666_v27 = vld [vmem:[%s2121_s1 + $0x78] sm:$0xff]   ;;  %s1787_s27 = smov [#allocation5]  }
  0x40   : > { %1279 = vmatprep.subr.msk.bf16.mxu0 %vm410_vm0, %v1278_v2  ;;  %v412_v4 = vsel %vm410_vm0, %v1277_v3, 0  ;;  %v1667_v28 = vld [vmem:[%s2121_s1 + $0x38] sm:$0xff]   ;;  %p1698_p11 = pnand %p1697_p8, %p2139_p10  ;;  %s1700_s10 = sshll.u32 %s1787_s27, 4  ;;  %s1701_s10 = int_to_ptr.vmem [resolvable:$false] %s1700_s10 }
  0x41   : > { %418 = vmatpush1.bf16.msra.mxu0 %v412_v4  ;;  %s1702_s12 = scalar_lea.vmem %s1701_s10, 32  ;;  %p1703_p1 = scmp.lt.s32.totalorder %s2075_s22, %s1701_s10 }
  0x42   : > { %1313 = vmatpush3.bf16.msra.mxu1 %v1657_v12  ;;  %p1699_p13 = pneg %p1698_p11  ;;  %p1704_p3 = scmp.lt.s32.totalorder %s1702_s12, %s1696_s8 }
  0x43   : > { %1314 = vmatprep.subr.bf16.mxu1 %v1658_v13 }
  0x44   : > { %1280 = vmatmul.mubr.msk.bf16.vlgmr.msra.gmra.mrb[0].mxu0 %vm385_vm1, %v1644_v5  ;;  %p1705_p5 = por %p1704_p3, %p1703_p1 }
  0x45   : > { %459 = vmatprep.mubr.bf16.mxu0 %v1783_v0 }
  0x46   : > { %1315 = vmatpush3.bf16.msra.mxu1 %v1659_v15  ;;  %p1706_p6 = pnand %p1705_p5, %p1699_p13 }
  0x47   : > { %1316 = vmatprep.subr.bf16.mxu1 %v1660_v16 }
  0x4a   : > { %1317 = vmatpush3.bf16.msra.mxu1 %v1661_v17 }
  0x4b   : > { %1318 = vmatprep.subr.bf16.mxu1 %v1662_v18 }
  0x4c   : > { %1281 = vmatmul.mubr.msk.bf16.gmra.mrb[4].mxu0 %vm385_vm1, %v1645_v6 }
  0x4d   : > { %469 = vmatprep.mubr.bf16.mxu0 %v1783_v0 }
  0x4e   : > { %1319 = vmatpush3.bf16.msra.mxu1 %v1663_v20 }
  0x4f   : > { %1320 = vmatprep.subr.bf16.mxu1 %v1664_v25 }
  0x52   : > { %1321 = vmatpush3.bf16.msra.mxu1 %v1665_v26 }
  0x53   : > { %1322 = vmatprep.subr.bf16.mxu1 %v1666_v27 }
  0x54   : > { %1282 = vmatmul.mubr.msk.bf16.gmra.mrb[8].mxu0 %vm385_vm1, %v1646_v14 }
  0x55   : > { %479 = vmatprep.mubr.bf16.mxu0 %v1783_v0 }
  0x56   : > { %1323 = vmatpush3.bf16.msra.mxu1 %v1667_v28 }
  0x5c   : > { %1283 = vmatmul.mubr.msk.bf16.gmra.mrb[12].mxu0 %vm385_vm1, %v1647_v19 }
  0x5d   : > { %489 = vmatprep.mubr.bf16.mxu0 %v1783_v0 }
  0x64   : > { %1284 = vmatmul.mubr.msk.bf16.gmra.mrb[16].mxu0 %vm385_vm1, %v1648_v21 }
  0x65   : > { %499 = vmatprep.mubr.bf16.mxu0 %v1783_v0 }
  0x6c   : > { %1285 = vmatmul.mubr.msk.bf16.gmra.mrb[20].mxu0 %vm385_vm1, %v1649_v22 }
  0x6d   : > { %509 = vmatprep.mubr.bf16.mxu0 %v1783_v0 }
  0x74   : > { %1286 = vmatmul.mubr.msk.bf16.gmra.mrb[24].mxu0 %vm385_vm1, %v1650_v23 }
  0x75   : > { %519 = vmatprep.mubr.bf16.mxu0 %v1783_v0 }
  0x7c   : > { %1287 = vmatmul.mubr.msk.bf16.gmra.mrb[28].mxu0 %vm385_vm1, %v1651_v24 }
 0x117   : > { %v451_v29 = vpop.f32.mrb[0].mxu0 }
 0x118   : > { %v453_v30 = vpop.f32.mrb[1].mxu0  ;;  %v530_v32 = vmax.f32 %v451_v29, 0.0 }
 0x119   : > { %v455_v31 = vpop.f32.mrb[2].mxu0  ;;  %v531_v35 = vmax.f32 %v453_v30, 0.0 }
 0x11a   : > { %v532_v33 = vmax.f32 %v455_v31, 0.0  ;;  %v457_v34 = vpop.f32.mrb[3].mxu0 }
 0x11b   : > { %v533_v36 = vmax.f32 %v457_v34, 0.0 }
 0x11c   : > { %v562_v37 = vpack.c.bf16 %v532_v33, %v530_v32 }
 0x11d   : > { %v563_v38 = vpack.c.bf16 %v533_v36, %v531_v35 }
 0x11f   : > { %v461_v39 = vpop.f32.mrb[4].mxu0  ;;  %738 = vmatprep.mubr.bf16.mxu1 %v563_v38 }
 0x120   : > { %v463_v40 = vpop.f32.mrb[5].mxu0  ;;  %739 = vmatmul.mubr.bf16.vlgmr.msra.gmra.mrb[0].mxu1 %v562_v37  ;;  %v534_v42 = vmax.f32 %v461_v39, 0.0 }
 0x121   : > { %v465_v41 = vpop.f32.mrb[6].mxu0  ;;  %v535_v45 = vmax.f32 %v463_v40, 0.0 }
 0x122   : > { %v536_v43 = vmax.f32 %v465_v41, 0.0  ;;  %v467_v44 = vpop.f32.mrb[7].mxu0 }
 0x123   : > { %v537_v46 = vmax.f32 %v467_v44, 0.0 }
 0x124   : > { %v564_v47 = vpack.c.bf16 %v536_v43, %v534_v42 }
 0x125   : > { %v565_v48 = vpack.c.bf16 %v537_v46, %v535_v45  ;;  %v803_v45 = vld [vmem:[#allocation2] sm:$0xff] }
 0x126   : > { %1453 = vmatprep.mubr.f32.mxu0 %v803_v45  ;;  %v819_v46 = vld [vmem:[%s2124_s4] sm:$0xff] }
 0x127   : > { %v471_v49 = vpop.f32.mrb[8].mxu0  ;;  %746 = vmatprep.mubr.bf16.mxu1 %v565_v48  ;;  %837 = vperm.xlu0 %1640, %v819_v46   ;;  %v820_v48 = vld [vmem:[%s2124_s4 + $0x8] sm:$0xff] }
 0x128   : > { %v473_v50 = vpop.f32.mrb[9].mxu0  ;;  %747 = vmatmul.mubr.bf16.gmra.mrb[4].mxu1 %v564_v47  ;;  %v538_v52 = vmax.f32 %v471_v49, 0.0  ;;  %v821_v47 = vld [vmem:[%s2124_s4 + $0x10] sm:$0xff]  ;;  %v822_v49 = vld [vmem:[%s2124_s4 + $0x18] sm:$0xff] }
 0x129   : > { %v475_v51 = vpop.f32.mrb[10].mxu0  ;;  %v539_v55 = vmax.f32 %v473_v50, 0.0  ;;  %847 = vperm.xlu1 %1641, %v821_v47   ;;  %v823_v50 = vld [vmem:[%s2124_s4 + $0x20] sm:$0xff] }
 0x12a   : > { %v540_v53 = vmax.f32 %v475_v51, 0.0  ;;  %v477_v54 = vpop.f32.mrb[11].mxu0  ;;  %v824_v51 = vld [vmem:[%s2124_s4 + $0x28] sm:$0xff] }
 0x12b   : > { %v541_v56 = vmax.f32 %v477_v54, 0.0  ;;  %842 = vperm.xlu0 %1640, %v820_v48   ;;  %v827_v54 = vld [vmem:[%s2124_s4 + $0x40] sm:$0xff] }
 0x12c   : > { %v566_v57 = vpack.c.bf16 %v540_v53, %v538_v52  ;;  %v825_v52 = vld [vmem:[%s2124_s4 + $0x30] sm:$0xff]  ;;  %v826_v53 = vld [vmem:[%s2124_s4 + $0x38] sm:$0xff] }
 0x12d   : > { %v567_v58 = vpack.c.bf16 %v541_v56, %v539_v55  ;;  %852 = vperm.xlu1 %1641, %v822_v49   ;;  %v828_v55 = vld [vmem:[%s2124_s4 + $0x48] sm:$0xff]  ;;  %v829_v56 = vld [vmem:[%s2124_s4 + $0x50] sm:$0xff] }
 0x12f   : > { %v481_v59 = vpop.f32.mrb[12].mxu0  ;;  %754 = vmatprep.mubr.bf16.mxu1 %v567_v58  ;;  %857 = vperm.xlu0 %1640, %v823_v50   ;;  %v831_v58 = vld [vmem:[%s2124_s4 + $0x60] sm:$0xff] }
 0x130   : > { %v483_v60 = vpop.f32.mrb[13].mxu0  ;;  %755 = vmatmul.mubr.bf16.gmra.mrb[8].mxu1 %v566_v57  ;;  %v542_v62 = vmax.f32 %v481_v59, 0.0  ;;  %v830_v57 = vld [vmem:[%s2124_s4 + $0x58] sm:$0xff]  ;;  %v832_v59 = vld [vmem:[%s2124_s4 + $0x68] sm:$0xff] }
 0x131   : > { %v485_v61 = vpop.f32.mrb[14].mxu0  ;;  %v543_v1 = vmax.f32 %v483_v60, 0.0  ;;  %862 = vperm.xlu1 %1641, %v824_v51   ;;  %v833_v60 = vld [vmem:[%s2124_s4 + $0x70] sm:$0xff] }
 0x132   : > { %v544_v63 = vmax.f32 %v485_v61, 0.0  ;;  %v487_v0 = vpop.f32.mrb[15].mxu0  ;;  %v834_v61 = vld [vmem:[%s2124_s4 + $0x78] sm:$0xff] }
 0x133   : > { %v545_v2 = vmax.f32 %v487_v0, 0.0  ;;  %867 = vperm.xlu0 %1640, %v825_v52  }
 0x134   : > { %v568_v3 = vpack.c.bf16 %v544_v63, %v542_v62 }
 0x135   : > { %v569_v4 = vpack.c.bf16 %v545_v2, %v543_v1  ;;  %872 = vperm.xlu1 %1641, %v826_v53  }
 0x137   : > { %v491_v5 = vpop.f32.mrb[16].mxu0  ;;  %762 = vmatprep.mubr.bf16.mxu1 %v569_v4  ;;  %877 = vperm.xlu0 %1640, %v827_v54   ;;  %v804_v54 = vld [vmem:[#allocation2 + $0x8] sm:$0xff] }
 0x138   : > { %v493_v6 = vpop.f32.mrb[17].mxu0  ;;  %763 = vmatmul.mubr.bf16.gmra.mrb[12].mxu1 %v568_v3  ;;  %v546_v8 = vmax.f32 %v491_v5, 0.0 }
 0x139   : > { %v495_v7 = vpop.f32.mrb[18].mxu0  ;;  %v547_v11 = vmax.f32 %v493_v6, 0.0  ;;  %882 = vperm.xlu1 %1641, %v828_v55   ;;  %v805_v55 = vld [vmem:[#allocation2 + $0x10] sm:$0xff] }
 0x13a   : > { %v548_v9 = vmax.f32 %v495_v7, 0.0  ;;  %v497_v10 = vpop.f32.mrb[19].mxu0 }
 0x13b   : > { %v549_v12 = vmax.f32 %v497_v10, 0.0  ;;  %887 = vperm.xlu0 %1640, %v829_v56   ;;  %v806_v56 = vld [vmem:[#allocation2 + $0x18] sm:$0xff] }
 0x13c   : > { %v570_v13 = vpack.c.bf16 %v548_v9, %v546_v8 }
 0x13d   : > { %v571_v14 = vpack.c.bf16 %v549_v12, %v547_v11  ;;  %892 = vperm.xlu1 %1641, %v830_v57   ;;  %v807_v57 = vld [vmem:[#allocation2 + $0x20] sm:$0xff] }
 0x13f   : > { %v501_v15 = vpop.f32.mrb[20].mxu0  ;;  %770 = vmatprep.mubr.bf16.mxu1 %v571_v14  ;;  %897 = vperm.xlu0 %1640, %v831_v58   ;;  %v808_v58 = vld [vmem:[#allocation2 + $0x28] sm:$0xff] }
 0x140   : > { %v503_v16 = vpop.f32.mrb[21].mxu0  ;;  %771 = vmatmul.mubr.bf16.gmra.mrb[16].mxu1 %v570_v13  ;;  %v550_v18 = vmax.f32 %v501_v15, 0.0 }
 0x141   : > { %v505_v17 = vpop.f32.mrb[22].mxu0  ;;  %v551_v21 = vmax.f32 %v503_v16, 0.0  ;;  %902 = vperm.xlu1 %1641, %v832_v59   ;;  %v809_v59 = vld [vmem:[#allocation2 + $0x30] sm:$0xff] }
 0x142   : > { %v552_v19 = vmax.f32 %v505_v17, 0.0  ;;  %v507_v20 = vpop.f32.mrb[23].mxu0 }
 0x143   : > { %v553_v22 = vmax.f32 %v507_v20, 0.0  ;;  %907 = vperm.xlu0 %1640, %v833_v60   ;;  %v810_v60 = vld [vmem:[#allocation2 + $0x38] sm:$0xff] }
 0x144   : > { %v572_v23 = vpack.c.bf16 %v552_v19, %v550_v18 }
 0x145   : > { %v573_v24 = vpack.c.bf16 %v553_v22, %v551_v21  ;;  %912 = vperm.xlu1 %1641, %v834_v61   ;;  %v811_v61 = vld [vmem:[#allocation2 + $0x40] sm:$0xff] }
 0x147   : > { %v511_v25 = vpop.f32.mrb[24].mxu0  ;;  %778 = vmatprep.mubr.bf16.mxu1 %v573_v24 }
 0x148   : > { %v513_v26 = vpop.f32.mrb[25].mxu0  ;;  %779 = vmatmul.mubr.bf16.gmra.mrb[20].mxu1 %v572_v23  ;;  %v554_v28 = vmax.f32 %v511_v25, 0.0 }
 0x149   : > { %v515_v27 = vpop.f32.mrb[26].mxu0  ;;  %v555_v31 = vmax.f32 %v513_v26, 0.0 }
 0x14a   : > { %v556_v29 = vmax.f32 %v515_v27, 0.0  ;;  %v517_v30 = vpop.f32.mrb[27].mxu0 }
 0x14b   : > { %v557_v32 = vmax.f32 %v517_v30, 0.0 }
 0x14c   : > { %v574_v33 = vpack.c.bf16 %v556_v29, %v554_v28 }
 0x14d   : > { %v575_v34 = vpack.c.bf16 %v557_v32, %v555_v31 }
 0x14f   : > { %v521_v35 = vpop.f32.mrb[28].mxu0  ;;  %786 = vmatprep.mubr.bf16.mxu1 %v575_v34 }
 0x150   : > { %v523_v36 = vpop.f32.mrb[29].mxu0  ;;  %787 = vmatmul.mubr.bf16.gmra.mrb[24].mxu1 %v574_v33  ;;  %v558_v38 = vmax.f32 %v521_v35, 0.0 }
 0x151   : > { %v525_v37 = vpop.f32.mrb[30].mxu0  ;;  %v559_v41 = vmax.f32 %v523_v36, 0.0 }
 0x152   : > { %v560_v39 = vmax.f32 %v525_v37, 0.0  ;;  %v527_v40 = vpop.f32.mrb[31].mxu0 }
 0x153   : > { %v561_v42 = vmax.f32 %v527_v40, 0.0 }
 0x154   : > { %v576_v43 = vpack.c.bf16 %v560_v39, %v558_v38 }
 0x155   : > { %v577_v44 = vpack.c.bf16 %v561_v42, %v559_v41 }
 0x157   : > { %794 = vmatprep.mubr.bf16.mxu1 %v577_v44 }
 0x158   : > { %795 = vmatmul.mubr.bf16.gmra.mrb[28].mxu1 %v576_v43 }
 0x1f3   : > { %v1324_v62 = vpop.f32.mrb[0].mxu1 }
 0x1f4   : > { %v1325_v63 = vpop.f32.mrb[1].mxu1 }
 0x1f5   : > { %v1326_v0 = vadd.f32 %v1325_v63, %v1324_v62  ;;  %v1327_v1 = vpop.f32.mrb[2].mxu1  ;;  %v812_v62 = vld [vmem:[#allocation2 + $0x48] sm:$0xff]  ;;  %v813_v63 = vld [vmem:[#allocation2 + $0x50] sm:$0xff] }
 0x1f6   : > { %v1328_v2 = vpop.f32.mrb[3].mxu1 }
 0x1f7   : > { %v1329_v3 = vadd.f32 %v1328_v2, %v1327_v1  ;;  %v815_v1 = vld [vmem:[#allocation2 + $0x60] sm:$0xff]  ;;  %v816_v2 = vld [vmem:[#allocation2 + $0x68] sm:$0xff] }
 0x1f9   : > { %v1512_v4 = vpack.c.bf16 %v1329_v3, %v1326_v0  ;;  %v814_v0 = vld [vmem:[#allocation2 + $0x58] sm:$0xff]  ;;  %v817_v3 = vld [vmem:[#allocation2 + $0x70] sm:$0xff] }
 0x1fb   : > { %v1330_v5 = vpop.f32.mrb[4].mxu1  ;;  %1513 = vmatprep.subr.bf16.mxu0 %v1512_v4 }
 0x1fc   : > { %v1331_v6 = vpop.f32.mrb[5].mxu1  ;;  %1515 = vmatpush3.bf16.msra.mxu0 %v1512_v4  ;;  %v818_v4 = vld [vmem:[#allocation2 + $0x78] sm:$0xff] }
 0x1fd   : > { %v1332_v7 = vadd.f32 %v1331_v6, %v1330_v5  ;;  %v1333_v8 = vpop.f32.mrb[6].mxu1  ;;  %v1784_v5 = vmov 0.0|0.0   ;;  %v1786_v6 = vmov 0.0  }
 0x1fe   : > { %v1334_v9 = vpop.f32.mrb[7].mxu1  ;;  %1544 = vmatprep.subr.bf16.mxu1 %v1784_v5  ;;  %1509 = vmatprep.mubr.msk.f32.mxu1 %vm1785_vm2, %v1786_v6 }
 0x1ff   : > { %v1335_v10 = vadd.f32 %v1334_v9, %v1333_v8  ;;  %v838_v8 = vpop.permute.xlu0 %837 }
 0x201   : > { %v1516_v11 = vpack.c.bf16 %v1335_v10, %v1332_v7  ;;  %v848_v7 = vpop.permute.xlu1 %847 }
 0x203   : > { %v1336_v12 = vpop.f32.mrb[8].mxu1  ;;  %1517 = vmatprep.subr.bf16.mxu0 %v1516_v11  ;;  %v843_v10 = vpop.permute.xlu0 %842 }
 0x204   : > { %v1337_v13 = vpop.f32.mrb[9].mxu1  ;;  %1519 = vmatpush3.bf16.msra.mxu0 %v1516_v11 }
 0x205   : > { %v1338_v14 = vadd.f32 %v1337_v13, %v1336_v12  ;;  %v1339_v15 = vpop.f32.mrb[10].mxu1  ;;  %v853_v9 = vpop.permute.xlu1 %852 }
 0x206   : > { %v1340_v16 = vpop.f32.mrb[11].mxu1 }
 0x207   : > { %v1341_v17 = vadd.f32 %v1340_v16, %v1339_v15  ;;  %v858_v12 = vpop.permute.xlu0 %857 }
 0x209   : > { %v1520_v18 = vpack.c.bf16 %v1341_v17, %v1338_v14  ;;  %v863_v11 = vpop.permute.xlu1 %862 }
 0x20b   : > { %v1342_v19 = vpop.f32.mrb[12].mxu1  ;;  %1521 = vmatprep.subr.bf16.mxu0 %v1520_v18 }
 0x20c   : > { %v1343_v20 = vpop.f32.mrb[13].mxu1  ;;  %1523 = vmatpush3.bf16.msra.mxu0 %v1520_v18 }
 0x20d   : > { %v1344_v21 = vadd.f32 %v1343_v20, %v1342_v19  ;;  %v1345_v22 = vpop.f32.mrb[14].mxu1  ;;  %v873_v18 = vpop.permute.xlu1 %872 }
 0x20e   : > { %v1346_v23 = vpop.f32.mrb[15].mxu1 }
 0x20f   : > { %v1347_v24 = vadd.f32 %v1346_v23, %v1345_v22 }
 0x211   : > { %v1524_v25 = vpack.c.bf16 %v1347_v24, %v1344_v21  ;;  %v868_v21 = vpop.permute.xlu0 %867 }
 0x213   : > { %v1348_v26 = vpop.f32.mrb[16].mxu1  ;;  %1525 = vmatprep.subr.bf16.mxu0 %v1524_v25 }
 0x214   : > { %v1349_v27 = vpop.f32.mrb[17].mxu1  ;;  %1527 = vmatpush3.bf16.msra.mxu0 %v1524_v25 }
 0x215   : > { %v1350_v28 = vadd.f32 %v1349_v27, %v1348_v26  ;;  %v1351_v29 = vpop.f32.mrb[18].mxu1 }
 0x216   : > { %v1352_v30 = vpop.f32.mrb[19].mxu1 }
 0x217   : > { %v1353_v31 = vadd.f32 %v1352_v30, %v1351_v29 }
 0x219   : > { %v1528_v32 = vpack.c.bf16 %v1353_v31, %v1350_v28  ;;  %v883_v31 = vpop.permute.xlu1 %882 }
 0x21b   : > { %v1354_v33 = vpop.f32.mrb[20].mxu1  ;;  %1529 = vmatprep.subr.bf16.mxu0 %v1528_v32 }
 0x21c   : > { %v1355_v34 = vpop.f32.mrb[21].mxu1  ;;  %1531 = vmatpush3.bf16.msra.mxu0 %v1528_v32 }
 0x21d   : > { %v1356_v35 = vadd.f32 %v1355_v34, %v1354_v33  ;;  %v1357_v36 = vpop.f32.mrb[22].mxu1  ;;  %v878_v34 = vpop.permute.xlu0 %877 }
 0x21e   : > { %v1358_v37 = vpop.f32.mrb[23].mxu1 }
 0x21f   : > { %v1359_v38 = vadd.f32 %v1358_v37, %v1357_v36 }
 0x221   : > { %v1532_v39 = vpack.c.bf16 %v1359_v38, %v1356_v35 }
 0x223   : > { %v1360_v40 = vpop.f32.mrb[24].mxu1  ;;  %1533 = vmatprep.subr.bf16.mxu0 %v1532_v39 }
 0x224   : > { %v1361_v41 = vpop.f32.mrb[25].mxu1  ;;  %1535 = vmatpush3.bf16.msra.mxu0 %v1532_v39 }
 0x225   : > { %v1362_v42 = vadd.f32 %v1361_v41, %v1360_v40  ;;  %v1363_v43 = vpop.f32.mrb[26].mxu1 }
 0x226   : > { %v1364_v44 = vpop.f32.mrb[27].mxu1 }
 0x227   : > { %v1365_v45 = vadd.f32 %v1364_v44, %v1363_v43  ;;  %v893_v43 = vpop.permute.xlu1 %892 }
 0x229   : > { %v1536_v46 = vpack.c.bf16 %v1365_v45, %v1362_v42 }
 0x22b   : > { %v1366_v47 = vpop.f32.mrb[28].mxu1  ;;  %1537 = vmatprep.subr.bf16.mxu0 %v1536_v46 }
 0x22c   : > { %v1367_v48 = vpop.f32.mrb[29].mxu1  ;;  %1539 = vmatpush3.bf16.msra.mxu0 %v1536_v46  ;;  %v888_v46 = vpop.permute.xlu0 %887 }
 0x22d   : > { %v1368_v49 = vadd.f32 %v1367_v48, %v1366_v47  ;;  %v1369_v50 = vpop.f32.mrb[30].mxu1 }
 0x22e   : > { %v1370_v51 = vpop.f32.mrb[31].mxu1 }
 0x22f   : > { %v1371_v52 = vadd.f32 %v1370_v51, %v1369_v50 }
 0x231   : > { %v1540_v53 = vpack.c.bf16 %v1371_v52, %v1368_v49 }
 0x233   : > { %1541 = vmatprep.subr.bf16.mxu0 %v1540_v53 }
 0x234   : > { %1543 = vmatpush3.bf16.msra.mxu0 %v1540_v53 }
 0x237   : > { %1454 = vmatmul.mubr.f32.vlgmr.msra.gmra.mrb[32].mxu0 %v804_v54 }
 0x238   : > { %1456 = vmatprep.mubr.f32.mxu0 %v805_v55 }
 0x23b   : > { %1457 = vmatmul.mubr.f32.gmra.mrb[34].mxu0 %v806_v56  ;;  %v903_v56 = vpop.permute.xlu1 %902 }
 0x23c   : > { %1459 = vmatprep.mubr.f32.mxu0 %v807_v57 }
 0x23f   : > { %1460 = vmatmul.mubr.f32.gmra.mrb[36].mxu0 %v808_v58 }
 0x240   : > { %1462 = vmatprep.mubr.f32.mxu0 %v809_v59  ;;  %v898_v59 = vpop.permute.xlu0 %897 }
 0x243   : > { %1463 = vmatmul.mubr.f32.gmra.mrb[38].mxu0 %v810_v60 }
 0x244   : > { %1465 = vmatprep.mubr.f32.mxu0 %v811_v61 }
 0x247   : > { %1466 = vmatmul.mubr.f32.gmra.mrb[40].mxu0 %v812_v62 }
 0x248   : > { %1468 = vmatprep.mubr.f32.mxu0 %v813_v63 }
 0x24b   : > { %1469 = vmatmul.mubr.f32.gmra.mrb[42].mxu0 %v814_v0 }
 0x24c   : > { %1471 = vmatprep.mubr.f32.mxu0 %v815_v1 }
 0x24f   : > { %1472 = vmatmul.mubr.f32.gmra.mrb[44].mxu0 %v816_v2 }
 0x250   : > { %1474 = vmatprep.mubr.f32.mxu0 %v817_v3 }
 0x253   : > { %1475 = vmatmul.mubr.f32.gmra.mrb[46].mxu0 %v818_v4  ;;  %v913_v4 = vpop.permute.xlu1 %912 }
 0x30a   : > { %v1455_v13 = vpop.f32.mrb[32].mxu0 }
 0x30b   : > { %v987_v14 = vadd.f32 %v1455_v13, %v843_v10  ;;  %v981_v15 = vpop.f32.mrb[33].mxu0 }
 0x30c   : > { %v982_v16 = vadd.f32 %v981_v15, %v838_v8  ;;  %v908_v8 = vpop.permute.xlu0 %907 }
 0x30d   : > { %v1061_v17 = vmax.f32 %v987_v14, 0.0 }
 0x30e   : > { %v1060_v19 = vmax.f32 %v982_v16, 0.0  ;;  %v1458_v20 = vpop.f32.mrb[34].mxu0  ;;  %v1076_v16 = vld [vmem:[%s2125_s5] sm:$0x1] }
 0x30f   : > { %v997_v22 = vadd.f32 %v1458_v20, %v853_v9  ;;  %v991_v23 = vpop.f32.mrb[35].mxu0 }
 0x310   : > { %v1545_v24 = vpack.c.bf16 %v1061_v17, %v1060_v19  ;;  %v992_v25 = vadd.f32 %v991_v23, %v848_v7  ;;  %v1147_v17 = vld [vmem:[%s2126_s6] sm:$0x3] }
 0x311   : > { %v1063_v26 = vmax.f32 %v997_v22, 0.0 }
 0x312   : > { %v1062_v27 = vmax.f32 %v992_v25, 0.0  ;;  %v1461_v28 = vpop.f32.mrb[36].mxu0  ;;  %1546 = vmatpush3.bf16.msra.mxu1 %v1545_v24 }
 0x313   : > { %v1007_v29 = vadd.f32 %v1461_v28, %v863_v11  ;;  %v1001_v30 = vpop.f32.mrb[37].mxu0  ;;  %1547 = vmatprep.subr.bf16.mxu1 %v1784_v5 }
 0x314   : > { %v1548_v32 = vpack.c.bf16 %v1063_v26, %v1062_v27  ;;  %v1002_v33 = vadd.f32 %v1001_v30, %v858_v12 }
 0x315   : > { %v1065_v35 = vmax.f32 %v1007_v29, 0.0 }
 0x316   : > { %v1064_v36 = vmax.f32 %v1002_v33, 0.0  ;;  %v1464_v37 = vpop.f32.mrb[38].mxu0  ;;  %1549 = vmatpush3.bf16.msra.mxu1 %v1548_v32 }
 0x317   : > { %v1017_v38 = vadd.f32 %v1464_v37, %v873_v18  ;;  %v1011_v39 = vpop.f32.mrb[39].mxu0  ;;  %1550 = vmatprep.subr.bf16.mxu1 %v1784_v5  ;;  %v1150_v18 = vrot.slane %v1147_v17, 1 }
 0x318   : > { %v1551_v40 = vpack.c.bf16 %v1065_v35, %v1064_v36  ;;  %v1012_v41 = vadd.f32 %v1011_v39, %v868_v21 }
 0x319   : > { %v1067_v42 = vmax.f32 %v1017_v38, 0.0 }
 0x31a   : > { %v1066_v44 = vmax.f32 %v1012_v41, 0.0  ;;  %v1467_v45 = vpop.f32.mrb[40].mxu0  ;;  %1552 = vmatpush3.bf16.msra.mxu1 %v1551_v40 }
 0x31b   : > { %v1027_v47 = vadd.f32 %v1467_v45, %v883_v31  ;;  %v1021_v48 = vpop.f32.mrb[41].mxu0  ;;  %1553 = vmatprep.subr.bf16.mxu1 %v1784_v5 }
 0x31c   : > { %v1554_v49 = vpack.c.bf16 %v1067_v42, %v1066_v44  ;;  %v1022_v50 = vadd.f32 %v1021_v48, %v878_v34 }
 0x31d   : > { %v1069_v51 = vmax.f32 %v1027_v47, 0.0 }
 0x31e   : > { %v1068_v52 = vmax.f32 %v1022_v50, 0.0  ;;  %v1470_v53 = vpop.f32.mrb[42].mxu0  ;;  %1555 = vmatpush3.bf16.msra.mxu1 %v1554_v49 }
 0x31f   : > { %v1037_v54 = vadd.f32 %v1470_v53, %v893_v43  ;;  %v1031_v55 = vpop.f32.mrb[43].mxu0  ;;  %1556 = vmatprep.subr.bf16.mxu1 %v1784_v5 }
 0x320   : > { %v1557_v57 = vpack.c.bf16 %v1069_v51, %v1068_v52  ;;  %v1032_v58 = vadd.f32 %v1031_v55, %v888_v46 }
 0x321   : > { %v1071_v60 = vmax.f32 %v1037_v54, 0.0 }
 0x322   : > { %v1070_v61 = vmax.f32 %v1032_v58, 0.0  ;;  %v1473_v62 = vpop.f32.mrb[44].mxu0  ;;  %1558 = vmatpush3.bf16.msra.mxu1 %v1557_v57 }
 0x323   : > { %v1047_v63 = vadd.f32 %v1473_v62, %v903_v56  ;;  %v1041_v0 = vpop.f32.mrb[45].mxu0  ;;  %1559 = vmatprep.subr.bf16.mxu1 %v1784_v5 }
 0x324   : > { %v1560_v1 = vpack.c.bf16 %v1071_v60, %v1070_v61  ;;  %v1042_v2 = vadd.f32 %v1041_v0, %v898_v59 }
 0x325   : > { %v1073_v3 = vmax.f32 %v1047_v63, 0.0 }
 0x326   : > { %v1072_v6 = vmax.f32 %v1042_v2, 0.0  ;;  %v1476_v7 = vpop.f32.mrb[46].mxu0  ;;  %1561 = vmatpush3.bf16.msra.mxu1 %v1560_v1 }
 0x327   : > { %v1057_v9 = vadd.f32 %v1476_v7, %v913_v4  ;;  %v1051_v10 = vpop.f32.mrb[47].mxu0  ;;  %1562 = vmatprep.subr.bf16.mxu1 %v1784_v5 }
 0x328   : > { %v1563_v11 = vpack.c.bf16 %v1073_v3, %v1072_v6  ;;  %v1052_v12 = vadd.f32 %v1051_v10, %v908_v8 }
 0x329   : > { %v1075_v13 = vmax.f32 %v1057_v9, 0.0 }
 0x32a   : > { %v1074_v14 = vmax.f32 %v1052_v12, 0.0  ;;  %1564 = vmatpush3.bf16.msra.mxu1 %v1563_v11 }
 0x32b   : > { %1565 = vmatprep.subr.bf16.mxu1 %v1784_v5 }
 0x32c   : > { %v1566_v15 = vpack.c.bf16 %v1075_v13, %v1074_v14 }
 0x32e   : > { %1567 = vmatpush3.bf16.msra.mxu1 %v1566_v15 }
 0x331   : > { %1510 = vmatmul.mubr.f32.vlgmr.msra.gmra.mrb[32].mxu1 %v1076_v16 }
 0x404   : > { %v1143_v19 = vpop.f32.mrb[32].mxu1 }
 0x405   : > { %v1148_v20 = vmul.f32 %v1147_v17, %v1143_v19  ;;  %v1511_v5 = vpop.f32.mrb[33].mxu1 }
 0x407   : > { %v1152_v21 = vadd.f32 %v1150_v18, %v1148_v20 }
 0x409   : > { %1153 = vst [vmem:[%s312_s19] sm:$0x1] %v1152_v21 }
 0x40a   : > { %1709 = shalt.err (!%p1706_p6)
}
 0x40b   : > { %s1710_s17 = scalar_lea.hbm %s2073_s15, 16  ;;  %s1714_s23 = scalar_lea.hbm %s2127_s7, 32 }
 0x40c   : > { %p1711_p7 = scmp.ne.s32.totalorder %s2073_s15, %s1710_s17  ;;  %p1715_p0 = scmp.lt.u32.totalorder %s2073_s15, %s2127_s7 }
 0x40d   : > { %p1716_p2 = scmp.lt.u32.totalorder %s1714_s23, %s1710_s17  ;;  %p1718_p8 = scmp.lt.u32.totalorder %s1710_s17, %s2073_s15 }
 0x40e   : > { %p1712_p9 = pnand %p1711_p7, %p2139_p10 }
 0x40f   : > { %p1717_p4 = por %p1716_p2, %p1715_p0 }
 0x410   : > { %p1713_p12 = pneg %p1712_p9 }
 0x411   : > { %p1719_p11 = por %p1718_p8, %p1717_p4 }
 0x413   : > { %p1720_p13 = pnand %p1719_p11, %p1713_p12 }
 0x415   : > { %1723 = shalt.err (!%p1720_p13)
}
 0x416   : > { %1572 = dma.vmem_to_hbm [thread:$0]  (%p2139_p10), %s2075_s22, 16, %s2073_s15, %s1155_s16  }
 0x417 PF: > { %p1584_p1 = scmp.ge.s32.totalorder %s1778_s29, 2  ;;  %s1180_s18 = sand.u32 1, %s1758_s24  }
 0x418   : > { %p2140_p3 = scmp.ne.s32.totalorder %s2133_s13, 0  ;;  %s1181_s8 = scalar_lea.sflag [#allocation4], %s1180_s18 }
 0x41a   : > { %p1579_p5 = pnand %p1584_p1, %p2140_p3 }
 0x41c   : > { %1753 = dma.done.wait (!%p1579_p5), %s1181_s8, 16  }
 0x41d   : > { %1755 = vsyncadd (!%p1579_p5), %s1181_s8, 4294967280  ;;  %s21_s29 = sadd.s32 1, %s1778_s29   ;;  %s2141_s24 = smov %s1762_s25 }
 0x41e   : > { %p18_p6 = scmp.ge.s32.totalorder %s21_s29, 4   ;;  %s2142_s25 = smov %s1766_s26 }
 0x41f   : > { %s2143_s26 = smov %s1881_s14  ;;  %s2144_s27 = smov %s1774_s28 }
 0x420   : > { %s2145_s28 = smov %s2147_s9  ;;  %20 = sbr.rel (!%p18_p6) target bundleno = 5 (0x5), region = 91 }
 0x427   :  { %1185 = vsyncpa [#allocation3], 1 }
 0x428   :  { %1187 = vsyncpa [#allocation3 + $0x1], 1 }
 0x429   :  { %1188 = vsyncpa [#allocation4], 1 }
 0x42a   :  { %1190 = vsyncpa [#allocation4 + $0x1], 1 }

</bundles_post_ra>
